<compile_context>
chip_gen: v7x
topology: tpu7x:2x2x1
jax: 0.10.0
libtpu: 0.0.40
codegen_flags: <defaults>
</compile_context>

<pallas_src>
import math

import jax
import jax.numpy as jnp
from jax.experimental import pallas as pl
from jax.experimental.pallas import tpu as pltpu


def _mlp_kernel(x_ref, w1_ref, b1_ref, w2_ref, b2_ref, w3_ref, b3_ref, o_ref):
    # Feature-major: features on sublanes, tokens (T tile) on lanes.
    x = x_ref[...].astype(jnp.bfloat16)                                    # (K, TT)
    h1 = jnp.dot(w1_ref[...], x, preferred_element_type=jnp.float32)      # (H, TT)
    h1 = jnp.maximum(h1 + b1_ref[...], 0.0)                               # f32 bias+ReLU
    h2 = jnp.dot(w2_ref[...], h1.astype(jnp.bfloat16),
                 preferred_element_type=jnp.float32)                       # (H, TT)
    h2 = jnp.maximum(h2 + b2_ref[...], 0.0)
    y = jnp.dot(w3_ref[...], h2.astype(jnp.bfloat16),
                preferred_element_type=jnp.float32)                        # (E, TT)
    o_ref[...] = (y + b3_ref[...]).astype(o_ref.dtype)                     # lane-dense store


def _pick_t_tile(T):
    # Largest lane-aligned (multiple-of-128) tile that divides T; otherwise the
    # whole axis (block_shape == full dim is always legal, just less pipelined).
    for tt in (512, 384, 256, 128):
        if T % tt == 0:
            return tt
    return T


def _resident(shape):
    # Constant block index across the grid -> tile stays VMEM-resident.
    zeros = (0,) * len(shape)
    return pl.BlockSpec(shape, lambda b, t: zeros)


def mlp_forward(x, params):
    """x: (B, d1, d2, d3, d4, T) float32 -> (B, T, num_emotions) float32."""
    w1, b1, w2, b2, w3, b3 = params          # PyTorch layout: W=(out, in), b=(out,)
    B = x.shape[0]
    T = x.shape[-1]
    input_dim = math.prod(x.shape[1:-1])
    hidden_dim = w1.shape[0]
    num_emotions = w3.shape[0]
    assert w1.shape[1] == input_dim

    # flatten(start_dim=1, end_dim=4): contiguous reshape, zero HBM traffic, and
    # NO transpose of the big activation -- the kernel consumes (B, input_dim, T).
    x3 = x.reshape(B, input_dim, T)

    TT = _pick_t_tile(T)
    grid = (B, T // TT)

    # bf16 MXU operands for the (tiny, VMEM-resident) weights; biases stay f32
    # columns so bias-add / ReLU run in f32 on every chip.
    w1b, w2b, w3b = (w.astype(jnp.bfloat16) for w in (w1, w2, w3))
    b1c = b1.reshape(hidden_dim, 1).astype(jnp.float32)
    b2c = b2.reshape(hidden_dim, 1).astype(jnp.float32)
    b3c = b3.reshape(num_emotions, 1).astype(jnp.float32)

    flops = 2 * B * T * (input_dim * hidden_dim
                         + hidden_dim * hidden_dim
                         + hidden_dim * num_emotions)
    bytes_accessed = (x3.size * 4
                      + (w1b.size + w2b.size + w3b.size) * 2
                      + (b1c.size + b2c.size + b3c.size) * 4
                      + B * T * num_emotions * 4)

    out = pl.pallas_call(
        _mlp_kernel,
        out_shape=jax.ShapeDtypeStruct((B, num_emotions, T), jnp.float32),
        grid=grid,
        in_specs=[
            # x tile: one batch element, all features (sublanes), TT tokens (lanes).
            pl.BlockSpec((None, input_dim, TT), lambda b, t: (b, 0, t)),
            _resident((hidden_dim, input_dim)),      # w1
            _resident((hidden_dim, 1)),              # b1
            _resident((hidden_dim, hidden_dim)),     # w2
            _resident((hidden_dim, 1)),              # b2
            _resident((num_emotions, hidden_dim)),   # w3
            _resident((num_emotions, 1)),            # b3
        ],
        out_specs=pl.BlockSpec((None, num_emotions, TT), lambda b, t: (b, 0, t)),
        compiler_params=pltpu.CompilerParams(
            dimension_semantics=("parallel", "parallel")),
        cost_estimate=pl.CostEstimate(
            flops=flops, transcendentals=0, bytes_accessed=bytes_accessed),
    )(x3, w1b, b1c, w2b, b2c, w3b, b3c)

    # Only the small output slab needs a layout swap to match the module's
    # (B, T, num_emotions); it typically fuses with downstream consumers.
    return jnp.transpose(out, (0, 2, 1))


def init_params(key, input_dim, hidden_dim, num_emotions):
    """Deterministic synthetic params in PyTorch nn.Linear layout: W=(out,in), b=(out,)."""
    ks = jax.random.split(key, 6)

    def lin(kw, kb, fan_in, fan_out):
        bound = 1.0 / jnp.sqrt(fan_in)
        w = jax.random.uniform(kw, (fan_out, fan_in), jnp.float32, -bound, bound)
        b = jax.random.uniform(kb, (fan_out,), jnp.float32, -bound, bound)
        return w, b

    w1, b1 = lin(ks[0], ks[1], input_dim, hidden_dim)
    w2, b2 = lin(ks[2], ks[3], hidden_dim, hidden_dim)
    w3, b3 = lin(ks[4], ks[5], hidden_dim, num_emotions)
    return (w1, b1, w2, b2, w3, b3)


if __name__ == "__main__":
    key = jax.random.PRNGKey(0)
    kx, kp = jax.random.split(key)

    # Small 6D input consistent with flatten(start_dim=1, end_dim=4):
    # (B=2, 2, 2, 2, 4, T=8) -> input_dim = 2*2*2*4 = 32
    B, d1, d2, d3, d4, T = 2, 2, 2, 2, 4, 8
    input_dim = d1 * d2 * d3 * d4
    hidden_dim = 32
    num_emotions = 8

    x = jax.random.normal(kx, (B, d1, d2, d3, d4, T), dtype=jnp.float32)
    params = init_params(kp, input_dim, hidden_dim, num_emotions)

    y = jax.jit(mlp_forward)(x, params)
    jax.block_until_ready(y)

    # Pure-JAX f32 reference (same math as the PyTorch module).
    w1, b1, w2, b2, w3, b3 = params
    xr = jnp.transpose(x.reshape(B, input_dim, T), (0, 2, 1))     # (B, T, K)
    h = jnp.maximum(xr @ w1.T + b1, 0.0)
    h = jnp.maximum(h @ w2.T + b2, 0.0)
    y_ref = h @ w3.T + b3

    assert y.shape == (B, T, num_emotions), y.shape
    # bf16 matmul operands (f32 accumulation) -> slightly loosened tolerance.
    err = float(jnp.max(jnp.abs(y - y_ref)))
    assert jnp.allclose(y, y_ref, atol=2e-2, rtol=2e-2), err

    print("KERNEL_OK")
</pallas_src>

<mosaic_0001>
module attributes {stable_mosaic.version = 11 : i64} {
  func.func @_mlp_kernel(%arg0: i32, %arg1: i32, %arg2: memref<1x32x8xf32, #tpu.memory_space<vmem>>, %arg3: memref<32x32xbf16, #tpu.memory_space<vmem>>, %arg4: memref<32x1xf32, #tpu.memory_space<vmem>>, %arg5: memref<32x32xbf16, #tpu.memory_space<vmem>>, %arg6: memref<32x1xf32, #tpu.memory_space<vmem>>, %arg7: memref<8x32xbf16, #tpu.memory_space<vmem>>, %arg8: memref<8x1xf32, #tpu.memory_space<vmem>>, %arg9: memref<1x8x8xf32, #tpu.memory_space<vmem>>) attributes {dimension_semantics = [#tpu.dimension_semantics<parallel>, #tpu.dimension_semantics<parallel>], iteration_bounds = array<i64: 2, 1>, scalar_prefetch = 0 : i64, scratch_operands = 0 : i64, tpu.core_type = #tpu.core_type<tc>, window_params = [{transform_indices = @transform_0, window_bounds = array<i64: 1, 32, 8>}, {pipeline_mode = #tpu.pipeline_mode<synchronous>, transform_indices = @transform_1, window_bounds = array<i64: 32, 32>}, {pipeline_mode = #tpu.pipeline_mode<synchronous>, transform_indices = @transform_2, window_bounds = array<i64: 32, 1>}, {pipeline_mode = #tpu.pipeline_mode<synchronous>, transform_indices = @transform_3, window_bounds = array<i64: 32, 32>}, {pipeline_mode = #tpu.pipeline_mode<synchronous>, transform_indices = @transform_4, window_bounds = array<i64: 32, 1>}, {pipeline_mode = #tpu.pipeline_mode<synchronous>, transform_indices = @transform_5, window_bounds = array<i64: 8, 32>}, {pipeline_mode = #tpu.pipeline_mode<synchronous>, transform_indices = @transform_6, window_bounds = array<i64: 8, 1>}, {transform_indices = @transform_7, window_bounds = array<i64: 1, 8, 8>}]} {
    %c0 = arith.constant 0 : index
    %c0_0 = arith.constant 0 : index
    %c0_1 = arith.constant 0 : index
    %0 = vector.load %arg2[%c0, %c0_0, %c0_1] : memref<1x32x8xf32, #tpu.memory_space<vmem>>, vector<1x32x8xf32>
    %1 = vector.shape_cast %0 : vector<1x32x8xf32> to vector<32x8xf32>
    %2 = arith.truncf %1 : vector<32x8xf32> to vector<32x8xbf16>
    %c0_2 = arith.constant 0 : index
    %c0_3 = arith.constant 0 : index
    %3 = vector.load %arg3[%c0_2, %c0_3] : memref<32x32xbf16, #tpu.memory_space<vmem>>, vector<32x32xbf16>
    %cst = arith.constant dense<0.000000e+00> : vector<32x8xf32>
    %4 = tpu.matmul %3, %2, %cst {dimension_numbers = #tpu.dot_dimension_numbers<[1], [0], [0], [1], [0, 0, 1, 1], [], []>} : vector<32x32xbf16>, vector<32x8xbf16>, vector<32x8xf32> -> vector<32x8xf32>
    %c0_4 = arith.constant 0 : index
    %c0_5 = arith.constant 0 : index
    %5 = vector.load %arg4[%c0_4, %c0_5] : memref<32x1xf32, #tpu.memory_space<vmem>>, vector<32x1xf32>
    %6 = vector.broadcast %5 : vector<32x1xf32> to vector<32x8xf32>
    %7 = arith.addf %4, %6 : vector<32x8xf32>
    %cst_6 = arith.constant 0.000000e+00 : f32
    %8 = vector.broadcast %cst_6 : f32 to vector<32x8xf32>
    %9 = arith.maximumf %7, %8 : vector<32x8xf32>
    %c0_7 = arith.constant 0 : index
    %c0_8 = arith.constant 0 : index
    %10 = vector.load %arg5[%c0_7, %c0_8] : memref<32x32xbf16, #tpu.memory_space<vmem>>, vector<32x32xbf16>
    %11 = arith.truncf %9 : vector<32x8xf32> to vector<32x8xbf16>
    %cst_9 = arith.constant dense<0.000000e+00> : vector<32x8xf32>
    %12 = tpu.matmul %10, %11, %cst_9 {dimension_numbers = #tpu.dot_dimension_numbers<[1], [0], [0], [1], [0, 0, 1, 1], [], []>} : vector<32x32xbf16>, vector<32x8xbf16>, vector<32x8xf32> -> vector<32x8xf32>
    %c0_10 = arith.constant 0 : index
    %c0_11 = arith.constant 0 : index
    %13 = vector.load %arg6[%c0_10, %c0_11] : memref<32x1xf32, #tpu.memory_space<vmem>>, vector<32x1xf32>
    %14 = vector.broadcast %13 : vector<32x1xf32> to vector<32x8xf32>
    %15 = arith.addf %12, %14 : vector<32x8xf32>
    %cst_12 = arith.constant 0.000000e+00 : f32
    %16 = vector.broadcast %cst_12 : f32 to vector<32x8xf32>
    %17 = arith.maximumf %15, %16 : vector<32x8xf32>
    %c0_13 = arith.constant 0 : index
    %c0_14 = arith.constant 0 : index
    %18 = vector.load %arg7[%c0_13, %c0_14] : memref<8x32xbf16, #tpu.memory_space<vmem>>, vector<8x32xbf16>
    %19 = arith.truncf %17 : vector<32x8xf32> to vector<32x8xbf16>
    %cst_15 = arith.constant dense<0.000000e+00> : vector<8x8xf32>
    %20 = tpu.matmul %18, %19, %cst_15 {dimension_numbers = #tpu.dot_dimension_numbers<[1], [0], [0], [1], [0, 0, 1, 1], [], []>} : vector<8x32xbf16>, vector<32x8xbf16>, vector<8x8xf32> -> vector<8x8xf32>
    %c0_16 = arith.constant 0 : index
    %c0_17 = arith.constant 0 : index
    %21 = vector.load %arg8[%c0_16, %c0_17] : memref<8x1xf32, #tpu.memory_space<vmem>>, vector<8x1xf32>
    %22 = vector.broadcast %21 : vector<8x1xf32> to vector<8x8xf32>
    %23 = arith.addf %20, %22 : vector<8x8xf32>
    %c0_18 = arith.constant 0 : index
    %c0_19 = arith.constant 0 : index
    %c0_20 = arith.constant 0 : index
    %24 = vector.load %arg9[%c0_18, %c0_19, %c0_20] : memref<1x8x8xf32, #tpu.memory_space<vmem>>, vector<1x8x8xf32>
    %25 = vector.shape_cast %24 : vector<1x8x8xf32> to vector<8x8xf32>
    %26 = vector.shape_cast %23 : vector<8x8xf32> to vector<1x8x8xf32>
    tpu.vector_store %arg9[%c0_18, %c0_19, %c0_20], %26 {strides = array<i32>} : memref<1x8x8xf32, #tpu.memory_space<vmem>>, vector<1x8x8xf32>,
    return
  }
  func.func @transform_0(%arg0: i32, %arg1: i32) -> (i32, i32, i32) {
    %c0_i32 = arith.constant 0 : i32
    %c0_i32_0 = arith.constant 0 : i32
    return %arg0, %c0_i32, %arg1 : i32, i32, i32
  }
  func.func @transform_1(%arg0: i32, %arg1: i32) -> (i32, i32) {
    %c0_i32 = arith.constant 0 : i32
    %c0_i32_0 = arith.constant 0 : i32
    %c0_i32_1 = arith.constant 0 : i32
    return %c0_i32, %c0_i32_0 : i32, i32
  }
  func.func @transform_2(%arg0: i32, %arg1: i32) -> (i32, i32) {
    %c0_i32 = arith.constant 0 : i32
    %c0_i32_0 = arith.constant 0 : i32
    %c0_i32_1 = arith.constant 0 : i32
    return %c0_i32, %c0_i32_0 : i32, i32
  }
  func.func @transform_3(%arg0: i32, %arg1: i32) -> (i32, i32) {
    %c0_i32 = arith.constant 0 : i32
    %c0_i32_0 = arith.constant 0 : i32
    %c0_i32_1 = arith.constant 0 : i32
    return %c0_i32, %c0_i32_0 : i32, i32
  }
  func.func @transform_4(%arg0: i32, %arg1: i32) -> (i32, i32) {
    %c0_i32 = arith.constant 0 : i32
    %c0_i32_0 = arith.constant 0 : i32
    %c0_i32_1 = arith.constant 0 : i32
    return %c0_i32, %c0_i32_0 : i32, i32
  }
  func.func @transform_5(%arg0: i32, %arg1: i32) -> (i32, i32) {
    %c0_i32 = arith.constant 0 : i32
    %c0_i32_0 = arith.constant 0 : i32
    %c0_i32_1 = arith.constant 0 : i32
    return %c0_i32, %c0_i32_0 : i32, i32
  }
  func.func @transform_6(%arg0: i32, %arg1: i32) -> (i32, i32) {
    %c0_i32 = arith.constant 0 : i32
    %c0_i32_0 = arith.constant 0 : i32
    %c0_i32_1 = arith.constant 0 : i32
    return %c0_i32, %c0_i32_0 : i32, i32
  }
  func.func @transform_7(%arg0: i32, %arg1: i32) -> (i32, i32, i32) {
    %c0_i32 = arith.constant 0 : i32
    %c0_i32_0 = arith.constant 0 : i32
    return %arg0, %c0_i32, %arg1 : i32, i32, i32
  }
}

</mosaic_0001>

<bundles_post_ra>
// kernel: mlp_forward.1
= control target key start
LH: loop header
LB: loop body
LE: loop exit
PB: predicated region body
PF: predicated region fallthrough
CT: control target
= control target key end

     0   :  { %s798_s24 = smov 0   ;;  %s800_s25 = smov 0   ;;  %s882_s0 = inlined_call_operand.vmem [shape: f32[2,32,8], index: 0, kind: input, shape index: {}]   ;;  %s883_s1 = inlined_call_operand.vmem [shape: bf16[32,32], index: 1, kind: input, shape index: {}]   ;;  %s884_s2 = inlined_call_operand.vmem [shape: f32[32,1], index: 2, kind: input, shape index: {}]   ;;  %s885_s3 = inlined_call_operand.vmem [shape: bf16[32,32], index: 3, kind: input, shape index: {}]   ;;  %s886_s4 = inlined_call_operand.vmem [shape: f32[32,1], index: 4, kind: input, shape index: {}]   ;;  %s887_s5 = inlined_call_operand.vmem [shape: bf16[8,32], index: 5, kind: input, shape index: {}]   ;;  %s888_s6 = inlined_call_operand.vmem [shape: f32[8,1], index: 6, kind: input, shape index: {}]   ;;  %s889_s7 = inlined_call_operand.vmem [shape: f32[2,8,8], index: 7, kind: output, shape index: {}]  }
   0x1   :  { %s802_s26 = smov 0  }
   0x2 LB: > { %s29_s27 = sadd.s32 1, %s749_s25  ;;  %p647_p0 = scmp.ge.s32.totalorder %s753_s26, 1  ;;  %s753_s26 = sphi %s802_s26, %s17_s26   ;;  %s749_s25 = sphi %s800_s25, %s891_s25   ;;  %s745_s24 = sphi %s798_s24, %s890_s24  }
   0x3   : > { %p31_p1 = scmp.ge.s32.totalorder %s29_s27, 2  ;;  %p256_p2 = scmp.lt.s32.totalorder %s753_s26, 3 }
   0x5   : > { %s893_s27 = smov (%p31_p1, %s29_s27), 0  ;;  %p257_p3 = pnand %p647_p0, %p256_p2 }
   0x6   : > { %p293_p4 = scmp.lt.s32.totalorder (!%p257_p3), %s745_s24, 1  ;;  %v727_v0 = vld [vmem:[%s883_s1] sm:$0xff] (!%p257_p3)   ;;  %vm353_vm0 = vcmask (!%p257_p3), 261120   ;;  %v321_v2 = vld [vmem:[%s884_s2 + $0x10] sm:$0xff] (!%p257_p3)  ;;  %v755_v3 = vmov (!%p257_p3), 0   ;;  %v320_v4 = vld [vmem:[%s884_s2 + $0x8] sm:$0xff] (!%p257_p3) }
   0x7   : > { %260 = sbr.rel (%p257_p3) target bundleno = 700 (0x2bc), region = 48  ;;  %678 = vmatprep.mubr.msk.bf16.mxu0 (!%p257_p3), %vm353_vm0, %v727_v0  ;;  %v319_v1 = vld [vmem:[%s884_s2] sm:$0xff] (!%p257_p3)  ;;  %725 = vset.pattern.permute.xlu0 (!%p257_p3), %v755_v3  ;;  %v322_v5 = vld [vmem:[%s884_s2 + $0x18] sm:$0xff] (!%p257_p3)  ;;  %v420_v13 = vld [vmem:[%s886_s4 + $0x8] sm:$0xff] (!%p257_p3)  ;;  %v756_v38 = vmov (!%p257_p3), 0.0   ;;  %vm757_vm1 = vmmov (!%p257_p3), 0  }
   0x8   : > { %726 = vset.pattern.permute.xlu1 (!%p257_p3), %v755_v3  ;;  %325 = vperm.xlu0 (!%p257_p3), %725, %v319_v1   ;;  %v419_v12 = vld [vmem:[%s886_s4] sm:$0xff] (!%p257_p3)  ;;  %v728_v14 = vld [vmem:[%s883_s1 + $0x8] sm:$0xff] (!%p257_p3)   ;;  %v421_v15 = vld [vmem:[%s886_s4 + $0x10] sm:$0xff] (!%p257_p3)  ;;  %vm564_vm2 = vcmask (!%p257_p3), 64512  }
   0x9   : > { %335 = vperm.xlu1 (!%p257_p3), %726, %v321_v2   ;;  %v422_v16 = vld [vmem:[%s886_s4 + $0x18] sm:$0xff] (!%p257_p3)  ;;  %v515_v17 = vld [vmem:[%s888_s6] sm:$0xff] (!%p257_p3)  ;;  %v730_v37 = vld [vmem:[%s885_s3 + $0x8] sm:$0xff] (!%p257_p3)  }
   0xa   : > { %v729_v18 = vld [vmem:[%s885_s3] sm:$0xff] (!%p257_p3)  }
   0xb   : > { %686 = vmatprep.mubr.msk.bf16.mxu1 (!%p257_p3), %vm353_vm0, %v729_v18  ;;  %v512_v57 = vld [vmem:[%s887_s5] sm:$0xf] (!%p257_p3) }
   0xc   : > { %330 = vperm.xlu0 (!%p257_p3), %725, %v320_v4  }
   0xd   : > { %340 = vperm.xlu1 (!%p257_p3), %726, %v322_v5  }
   0xe   : > { %s895_s24 = smov (!%p293_p4, %s745_s24), 1 }
   0xf   : > { %s662_s11 = sshll.u32 %s895_s24, 5 }
  0x10   : > { %s300_s18 = scalar_lea.vmem %s882_s0, %s662_s11  ;;  %425 = vperm.xlu0 %725, %v419_v12  }
  0x11   : > { %v309_v6 = vld [vmem:[%s300_s18] sm:$0xff]  ;;  %v310_v7 = vld [vmem:[%s300_s18 + $0x8] sm:$0xff]  ;;  %v311_v8 = vld [vmem:[%s300_s18 + $0x10] sm:$0xff]  ;;  %430 = vperm.xlu1 %726, %v420_v13  }
  0x12   : > { %v313_v9 = vpack.c.bf16 %v310_v7, %v309_v6  ;;  %v312_v10 = vld [vmem:[%s300_s18 + $0x18] sm:$0xff]  ;;  %s650_s18 = sshll.u32 %s895_s24, 3 }
  0x13   : > { %v314_v11 = vpack.c.bf16 %v312_v10, %v311_v8  ;;  %s307_s21 = scalar_lea.vmem %s889_s7, %s650_s18 }
  0x14   : > { %674 = vmatprep.subr.bf16.mxu0 %v313_v9  ;;  %435 = vperm.xlu0 %725, %v421_v15  }
  0x15   : > { %675 = vmatpush3.bf16.msra.mxu0 %v313_v9  ;;  %440 = vperm.xlu1 %726, %v422_v16  }
  0x16   : > { %676 = vmatprep.subr.bf16.mxu0 %v314_v11 }
  0x18   : > { %518 = vperm.xlu0 %725, %v515_v17  }
  0x19   : > { %677 = vmatpush3.bf16.msra.mxu0 %v314_v11 }
  0x1a   : > { %690 = vmatprep.subr.bf16.mxu0 %v756_v38 }
  0x1c   : > { %679 = vmatmul.mubr.msk.bf16.vlgmr.msra.gmra.mrb[0].mxu0 %vm353_vm0, %v728_v14 }
  0x1d   : > { %694 = vmatprep.mubr.msk.bf16.mxu0 %vm757_vm1, %v756_v38 }
  0x87   : > { %v326_v20 = vpop.permute.xlu0 %325 }
  0x88   : > { %v336_v19 = vpop.permute.xlu1 %335 }
  0x8b   : > { %v331_v27 = vpop.permute.xlu0 %330 }
  0x8c   : > { %v341_v24 = vpop.permute.xlu1 %340 }
  0x8f   : > { %v426_v39 = vpop.permute.xlu0 %425 }
  0x90   : > { %v431_v40 = vpop.permute.xlu1 %430 }
  0x93   : > { %v436_v41 = vpop.permute.xlu0 %435 }
  0x94   : > { %v441_v45 = vpop.permute.xlu1 %440 }
  0x97   : > { %v519_v58 = vpop.permute.xlu0 %518 }
  0xef   : > { %v680_v21 = vpop.f32.mrb[0].mxu0 }
  0xf0   : > { %v403_v22 = vadd.f32 %v680_v21, %v336_v19  ;;  %v394_v23 = vpop.f32.mrb[1].mxu0 }
  0xf1   : > { %v395_v25 = vadd.f32 %v394_v23, %v326_v20  ;;  %v681_v26 = vpop.f32.mrb[2].mxu0 }
  0xf2   : > { %v406_v28 = vadd.f32 %v681_v26, %v341_v24  ;;  %v397_v29 = vpop.f32.mrb[3].mxu0  ;;  %v411_v31 = vmax.f32 %v403_v22, 0.0 }
  0xf3   : > { %v398_v30 = vadd.f32 %v397_v29, %v331_v27  ;;  %v409_v33 = vmax.f32 %v395_v25, 0.0 }
  0xf4   : > { %v412_v32 = vmax.f32 %v406_v28, 0.0 }
  0xf5   : > { %v410_v34 = vmax.f32 %v398_v30, 0.0 }
  0xf6   : > { %v418_v35 = vpack.c.bf16 %v412_v32, %v411_v31 }
  0xf7   : > { %v417_v36 = vpack.c.bf16 %v410_v34, %v409_v33 }
  0xf9   : > { %682 = vmatprep.subr.bf16.mxu1 %v417_v36 }
  0xfa   : > { %683 = vmatpush3.bf16.msra.mxu1 %v417_v36 }
  0xfb   : > { %684 = vmatprep.subr.bf16.mxu1 %v418_v35 }
  0xfe   : > { %685 = vmatpush3.bf16.msra.mxu1 %v418_v35 }
 0x101   : > { %687 = vmatmul.mubr.msk.bf16.vlgmr.msra.gmra.mrb[0].mxu1 %vm353_vm0, %v730_v37 }
 0x1d4   : > { %v688_v42 = vpop.f32.mrb[0].mxu1 }
 0x1d5   : > { %v502_v43 = vadd.f32 %v688_v42, %v436_v41  ;;  %v493_v44 = vpop.f32.mrb[1].mxu1 }
 0x1d6   : > { %v494_v46 = vadd.f32 %v493_v44, %v426_v39  ;;  %v689_v47 = vpop.f32.mrb[2].mxu1 }
 0x1d7   : > { %v505_v48 = vadd.f32 %v689_v47, %v441_v45  ;;  %v496_v49 = vpop.f32.mrb[3].mxu1  ;;  %v510_v51 = vmax.f32 %v502_v43, 0.0 }
 0x1d8   : > { %v497_v50 = vadd.f32 %v496_v49, %v431_v40  ;;  %v508_v53 = vmax.f32 %v494_v46, 0.0 }
 0x1d9   : > { %v511_v52 = vmax.f32 %v505_v48, 0.0 }
 0x1da   : > { %v509_v54 = vmax.f32 %v497_v50, 0.0 }
 0x1db   : > { %v514_v55 = vpack.c.bf16 %v511_v52, %v510_v51 }
 0x1dc   : > { %v513_v56 = vpack.c.bf16 %v509_v54, %v508_v53 }
 0x1de   : > { %691 = vmatpush3.bf16.msra.mxu0 %v513_v56 }
 0x1df   : > { %692 = vmatprep.subr.bf16.mxu0 %v756_v38 }
 0x1e2   : > { %693 = vmatpush3.bf16.msra.mxu0 %v514_v55 }
 0x1e5   : > { %695 = vmatmul.mubr.msk.bf16.vlgmr.msra.gmra.mrb[4].mxu0 %vm353_vm0, %v512_v57 }
 0x2b8   : > { %v558_v59 = vpop.f32.mrb[4].mxu0 }
 0x2b9   : > { %v559_v60 = vadd.f32 %v558_v59, %v519_v58  ;;  %v696_v61 = vpop.f32.mrb[5].mxu0 }
 0x2ba   : > { %v561_v62 = vpop.f32.mrb[6].mxu0 }
 0x2bb   : > { %565 = vst.msk [vmem:[%s307_s21] sm:$0xff] %vm564_vm2, %v559_v60  ;;  %v697_v63 = vpop.f32.mrb[7].mxu0 }
 0x2bc PF: > { %s17_s26 = sadd.s32 1, %s753_s26   ;;  %s890_s24 = smov %s749_s25 }
 0x2bd   : > { %p14_p5 = scmp.ge.s32.totalorder %s17_s26, 4   ;;  %s891_s25 = smov %s893_s27 }
 0x2bf   :  { %16 = sbr.rel (!%p14_p5) target bundleno = 2 (0x2), region = 78 }

</bundles_post_ra>
